<compile_context>
chip_gen: v6e
topology: v6e:2x2x1
jax: 0.10.0
libtpu: 0.0.40
codegen_flags: <defaults>
</compile_context>

<pallas_src>
import functools

import jax
import jax.numpy as jnp
from jax.experimental import pallas as pl
from jax.experimental.pallas import tpu as pltpu


def _round_up(x: int, m: int) -> int:
    return ((x + m - 1) // m) * m


def _rand_init_kernel(bits_ref, out_ref, *, alpha, beta):
    """Map packed int32 random bits -> integer-valued f32 uniform in [alpha, beta]."""
    rng_size = float(beta - alpha + 1)
    # Keep 24 low bits: nonnegative and exactly representable in f32.
    pos = jnp.bitwise_and(bits_ref[...], jnp.int32(0x00FFFFFF))
    # Scale into [0, rng_size) with one fused-constant multiply, then floor.
    scaled = pos.astype(jnp.float32) * jnp.float32(rng_size / 16777216.0)
    # Clamp guards the rounding edge where scaled could land exactly on rng_size.
    idx = jnp.minimum(jnp.floor(scaled), jnp.float32(rng_size - 1.0))
    out_ref[...] = idx + jnp.float32(alpha)


def rand_init(x: jax.Array, rank: int, bounds: tuple[int, int], seed: int = 0):
    """JAX/Pallas equivalent of RandInit.forward(x) -> (u, v)."""
    alpha, beta = int(bounds[0]), int(bounds[1])
    *batch, M, N = x.shape
    R = rank

    # One fused, lane-dense slab holds both u (first M*R values) and v (next N*R).
    total = (M + N) * R
    rows_needed = pl.cdiv(total, 128)
    tile_rows = 512  # 512 x 128 x 4B = 256 KiB per buffer -> safe on v7x VMEM.
    if rows_needed <= tile_rows:
        tile_rows = max(8, _round_up(rows_needed, 8))
    rows = _round_up(rows_needed, tile_rows)
    grid = rows // tile_rows

    # Deterministic random bit source (replaces hardware PRNG for portability).
    key = jax.random.PRNGKey(seed)
    bits_u32 = jax.random.bits(key, (rows, 128), dtype=jnp.uint32)
    bits = jax.lax.bitcast_convert_type(bits_u32, jnp.int32)

    tile_bytes = tile_rows * 128 * 4
    kernel = functools.partial(_rand_init_kernel, alpha=alpha, beta=beta)

    flat = pl.pallas_call(
        kernel,
        out_shape=jax.ShapeDtypeStruct((rows, 128), jnp.float32),
        grid=(grid,),
        in_specs=[pl.BlockSpec((tile_rows, 128), lambda i: (i, 0))],
        out_specs=pl.BlockSpec((tile_rows, 128), lambda i: (i, 0)),
        compiler_params=pltpu.CompilerParams(
            dimension_semantics=("parallel",),
            vmem_limit_bytes=max(8 * tile_bytes, 1 << 20),
        ),
        cost_estimate=pl.CostEstimate(
            flops=5 * rows * 128,
            transcendentals=0,
            bytes_accessed=2 * rows * 128 * 4,
        ),
    )(bits)

    flat = flat.reshape(-1)
    u_small = flat[: M * R].reshape(M, R)
    v_small = flat[M * R : (M + N) * R].reshape(N, R)

    # torch .expand(): broadcast across batch dims, no new randomness per batch.
    # (Lazy under jit; consumers that fuse never materialize the expansion.)
    u = jnp.broadcast_to(u_small, (*batch, M, R))
    v = jnp.broadcast_to(v_small, (*batch, N, R))
    return u, v


if __name__ == "__main__":
    key = jax.random.PRNGKey(0)
    # Small shapes consistent with the module: x is (*batch, M, N).
    x = jax.random.normal(key, (2, 4, 16, 16), dtype=jnp.float32)

    rank = 8
    bounds = (-3, 3)

    u, v = rand_init(x, rank, bounds, seed=0)
    u, v = jax.block_until_ready((u, v))

    # Sanity checks on semantics.
    assert u.shape == (2, 4, 16, rank) and u.dtype == jnp.float32
    assert v.shape == (2, 4, 16, rank) and v.dtype == jnp.float32
    assert bool(jnp.all(u == jnp.round(u))) and bool(jnp.all(v == jnp.round(v)))
    assert bool(jnp.all((u >= bounds[0]) & (u <= bounds[1])))
    assert bool(jnp.all((v >= bounds[0]) & (v <= bounds[1])))
    # Broadcast semantics: identical across batch dims (like torch.expand).
    assert bool(jnp.all(u[0, 0] == u[1, 3])) and bool(jnp.all(v[0, 0] == v[1, 3]))

    print("KERNEL_OK")
</pallas_src>

<mosaic_0001>
module attributes {stable_mosaic.version = 11 : i64} {
  func.func @_rand_init_kernel(%arg0: i32, %arg1: memref<8x128xi32, #tpu.memory_space<vmem>>, %arg2: memref<8x128xf32, #tpu.memory_space<vmem>>) attributes {dimension_semantics = [#tpu.dimension_semantics<parallel>], iteration_bounds = array<i64: 1>, scalar_prefetch = 0 : i64, scratch_operands = 0 : i64, tpu.core_type = #tpu.core_type<tc>, window_params = [{transform_indices = @transform_0, window_bounds = array<i64: 8, 128>}, {transform_indices = @transform_1, window_bounds = array<i64: 8, 128>}]} {
    %c0 = arith.constant 0 : index
    %c0_0 = arith.constant 0 : index
    %0 = vector.load %arg1[%c0, %c0_0] : memref<8x128xi32, #tpu.memory_space<vmem>>, vector<8x128xi32>
    %c16777215_i32 = arith.constant 16777215 : i32
    %1 = vector.broadcast %c16777215_i32 : i32 to vector<8x128xi32>
    %2 = arith.andi %0, %1 : vector<8x128xi32>
    %3 = arith.sitofp %2 : vector<8x128xi32> to vector<8x128xf32>
    %cst = arith.constant 4.17232513E-7 : f32
    %4 = vector.broadcast %cst : f32 to vector<8x128xf32>
    %5 = arith.mulf %3, %4 : vector<8x128xf32>
    %6 = math.floor %5 : vector<8x128xf32>
    %cst_1 = arith.constant 6.000000e+00 : f32
    %7 = vector.broadcast %cst_1 : f32 to vector<8x128xf32>
    %8 = arith.minimumf %6, %7 : vector<8x128xf32>
    %cst_2 = arith.constant -3.000000e+00 : f32
    %9 = vector.broadcast %cst_2 : f32 to vector<8x128xf32>
    %10 = arith.addf %8, %9 : vector<8x128xf32>
    %c0_3 = arith.constant 0 : index
    %c0_4 = arith.constant 0 : index
    %11 = vector.load %arg2[%c0_3, %c0_4] : memref<8x128xf32, #tpu.memory_space<vmem>>, vector<8x128xf32>
    tpu.vector_store %arg2[%c0_3, %c0_4], %10 {strides = array<i32>} : memref<8x128xf32, #tpu.memory_space<vmem>>, vector<8x128xf32>,
    return
  }
  func.func @transform_0(%arg0: i32) -> (i32, i32) {
    %c0_i32 = arith.constant 0 : i32
    %c0_i32_0 = arith.constant 0 : i32
    return %arg0, %c0_i32 : i32, i32
  }
  func.func @transform_1(%arg0: i32) -> (i32, i32) {
    %c0_i32 = arith.constant 0 : i32
    %c0_i32_0 = arith.constant 0 : i32
    return %arg0, %c0_i32 : i32, i32
  }
}

</mosaic_0001>

<bundles_post_ra>
// kernel: tpu_custom_call.1
= control target key start
LH: loop header
LB: loop body
LE: loop exit
PB: predicated region body
PF: predicated region fallthrough
CT: control target
= control target key end

     0   :  { %6 = vsyncpa [#allocation3], 0  ;;  %s108_s0 = inlined_call_operand.hbm [shape: s32[8,128], index: 0, kind: input, shape index: {}]   ;;  %s109_s1 = inlined_call_operand.hbm [shape: f32[8,128], index: 1, kind: output, shape index: {}]  }
   0x1   :  { %7 = vsyncpa [#allocation4], 0  ;;  %s90_s6 = smov [#allocation2]  }
   0x2   :  { %s14_s7 = sshll.u32 %s90_s6, 4  ;;  %s15_s7 = int_to_ptr.vmem [resolvable:$true] %s14_s7 }
   0x3   :  { %s54_s8 = scalar_lea.vmem %s15_s7, 128  ;;  %p59_p1 = scmp.lt.s32.totalorder %s15_s7, %s15_s7 }
   0x4   :  { %p55_p0 = scmp.ne.s32.totalorder %s15_s7, %s54_s8  ;;  %p60_p2 = scmp.lt.s32.totalorder %s54_s8, %s54_s8 }
   0x6   :  { %p61_p3 = por %p60_p2, %p59_p1 }
   0x8   :  { %p62_p4 = pnand %p61_p3, %p55_p0 }
   0xa   :  { %65 = shalt.err (!%p62_p4)
}
   0xb   :  { %17 = dma.hbm_to_vmem [thread:$0]  %s108_s0, 128, %s15_s7, [#allocation3]  }
   0xc   :  { %86 = dma.done.wait [#allocation3], 128  }
   0xd   :  { %87 = vsyncadd [#allocation3], 4294967168  ;;  %v21_v0 = vld [vmem:[#allocation2] sm:$0xff]  ;;  %s91_s11 = smov [#allocation5]  }
   0xe   :  { %v22_v1 = vand.u32 16777215, %v21_v0  ;;  %s35_s12 = sshll.u32 %s91_s11, 4  ;;  %s36_s12 = int_to_ptr.vmem [resolvable:$true] %s35_s12 }
   0xf   :  { %s66_s13 = scalar_lea.vmem %s36_s12, 128  ;;  %p71_p6 = scmp.lt.s32.totalorder %s36_s12, %s36_s12 }
  0x10   :  { %v23_v2 = vcvt.s32.f32 %v22_v1  ;;  %p67_p5 = scmp.ne.s32.totalorder %s36_s12, %s66_s13  ;;  %p72_p7 = scmp.lt.s32.totalorder %s66_s13, %s66_s13 }
  0x12   :  { %v24_v3 = vmul.f32 4.172325e-07, %v23_v2  ;;  %p73_p8 = por %p72_p7, %p71_p6 }
  0x14   :  { %v25_v4 = vfloor.f32 %v24_v3  ;;  %p74_p9 = pnand %p73_p8, %p67_p5 }
  0x16   :  { %v26_v5 = vmin.f32 %v25_v4, 6.0 }
  0x18   :  { %v27_v6 = vadd.f32 -3.0, %v26_v5 }
  0x1a   :  { %28 = vst [vmem:[#allocation5] sm:$0xff] %v27_v6 }
  0x1b   :  { %77 = shalt.err (!%p74_p9)
}
  0x1c   :  { %38 = dma.vmem_to_hbm [thread:$0]  %s36_s12, 128, %s109_s1, [#allocation4]  }
  0x1d   :  { %88 = dma.done.wait [#allocation4], 128  }
  0x1e   :  { %89 = vsyncadd [#allocation4], 4294967168 }
  0x1f   :  { %42 = vsyncpa [#allocation3], 1 }
  0x20   :  { %43 = vsyncpa [#allocation4], 1 }

</bundles_post_ra>
